<compile_context>
chip_gen: v7x
topology: tpu7x:2x2x1
jax: 0.10.0
libtpu: 0.0.40
codegen_flags: <defaults>
</compile_context>

<pallas_src>
import jax
import jax.numpy as jnp
from jax import lax
from jax.experimental import pallas as pl
from jax.experimental.pallas import tpu as pltpu


def _round_up(n: int, m: int) -> int:
    return ((n + m - 1) // m) * m


def _softmaxed_mlp_kernel(x_ref, w1_ref, b1_ref, wd_ref, bd_ref, out_ref):
    """One batch tile: relu(x@W1+b1) @ wd + bd -> sigmoid -> [p0, 1-p0]."""
    x = x_ref[...]                                                   # (TB, F)

    # Hidden layer: MXU matmul with f32 accumulation, bias, ReLU.
    h = jnp.dot(x, w1_ref[...], preferred_element_type=jnp.float32)
    h = jnp.maximum(h + b1_ref[...], 0.0)                            # (TB, H)

    # Binary head folded into a matvec: d = logit0 - logit1.
    d = jnp.dot(h.astype(wd_ref.dtype), wd_ref[...],
                preferred_element_type=jnp.float32) + bd_ref[...]    # (TB, 1)

    # Exact 2-class softmax:
    #   p0 = sigmoid(d) = 0.5 + 0.5*tanh(d/2),   p1 = 0.5 - 0.5*tanh(d/2)
    # Single EUP transcendental per vreg; tanh saturates so no clamp needed
    # (also keeps garbage rows of a ragged last tile finite/ignorable — they
    # are masked on writeback anyway).
    t = 0.5 * jnp.tanh(0.5 * d)                                      # (TB, 1)

    # Lane 0 gets p0, lane 1 gets p1 = 1 - p0 (rows sum to exactly 1).
    cols = lax.broadcasted_iota(jnp.int32, out_ref.shape, 1)         # (TB, C)
    out_ref[...] = (0.5 + jnp.where(cols == 0, t, -t)).astype(out_ref.dtype)


def softmaxed_model(x, w1, b1, w2, b2, *, block_b: int = 8192,
                    stream_bf16: bool = False):
    """Fused MLP + Softmax(dim=1) for binary classification.

    x: (B, F) float32 -> probabilities (B, 2) float32.
    """
    B, F = x.shape
    H = w1.shape[1]
    C = w2.shape[1]
    assert w1.shape == (F, H) and b1.shape == (1, H)
    assert w2.shape == (H, C) and b2.shape == (1, C)
    assert C == 2, "sigmoid-form softmax head assumes 2 classes"

    # Fold the class difference into a single weight vector (host side, tiny,
    # done once -- not a per-batch data pass).
    wd = w2[:, 0:1] - w2[:, 1:2]                                      # (H, 1)
    bd = b2[:, 0:1] - b2[:, 1:2]                                      # (1, 1)

    if stream_bf16:
        # bf16 MXU inputs, f32 accumulation + f32 elementwise (works on all
        # gens incl. v5e, whose missing bf16 VPU/EUP is irrelevant here).
        # NOTE: will not meet a 1e-5 check against an f32 reference.
        x = x.astype(jnp.bfloat16)
        w1 = w1.astype(jnp.bfloat16)
        wd = wd.astype(jnp.bfloat16)

    # Batch tiling: no host-side padding; the last block may be ragged and is
    # masked on writeback (safe: no cross-row reductions in the kernel).
    TB = min(block_b, _round_up(B, 8))
    num_tiles = pl.cdiv(B, TB)
    if num_tiles > 1:
        # Rebalance so tiles are even and >=2 grid steps exist (v7x has two
        # TensorCores; "parallel" semantics shard the grid across them).
        TB = _round_up(pl.cdiv(B, num_tiles), 8)
        num_tiles = pl.cdiv(B, TB)

    cost = pl.CostEstimate(
        flops=2 * B * F * H + 2 * B * H + 2 * B * H,   # matmul + bias/relu + matvec
        transcendentals=B,                             # one tanh per row
        bytes_accessed=(B * F * x.dtype.itemsize
                        + (F * H) * w1.dtype.itemsize + H * b1.dtype.itemsize
                        + (H + 1) * wd.dtype.itemsize
                        + B * C * 4),
    )

    out = pl.pallas_call(
        _softmaxed_mlp_kernel,
        out_shape=jax.ShapeDtypeStruct((B, C), jnp.float32),
        grid=(num_tiles,),
        in_specs=[
            pl.BlockSpec((TB, F), lambda i: (i, 0)),   # x: streamed per tile
            pl.BlockSpec((F, H), lambda i: (0, 0)),    # W1: resident in VMEM
            pl.BlockSpec((1, H), lambda i: (0, 0)),    # b1: resident
            pl.BlockSpec((H, 1), lambda i: (0, 0)),    # wd: resident
            pl.BlockSpec((1, 1), lambda i: (0, 0)),    # bd: resident
        ],
        out_specs=pl.BlockSpec((TB, C), lambda i: (i, 0)),
        compiler_params=pltpu.CompilerParams(
            # Batch tiles are independent -> shards across TCs on v7x.
            dimension_semantics=("parallel",),
        ),
        cost_estimate=cost,
    )(x, w1, b1, wd, bd)

    return out


def _reference(x, w1, b1, w2, b2):
    h = jnp.maximum(x @ w1 + b1, 0.0)
    logits = h @ w2 + b2
    return jax.nn.softmax(logits, axis=1)


if __name__ == "__main__":
    # Small shapes consistent with the forward: batch=8, in_features=32,
    # hidden=32, num_classes=2 (binary classification).
    B, F, H, C = 8, 32, 32, 2

    key = jax.random.PRNGKey(0)
    kx, k1, kb1, k2, kb2 = jax.random.split(key, 5)
    x = jax.random.normal(kx, (B, F), dtype=jnp.float32)
    w1 = jax.random.normal(k1, (F, H), dtype=jnp.float32) * 0.1
    b1 = jax.random.normal(kb1, (1, H), dtype=jnp.float32) * 0.1
    w2 = jax.random.normal(k2, (H, C), dtype=jnp.float32) * 0.1
    b2 = jax.random.normal(kb2, (1, C), dtype=jnp.float32) * 0.1

    out = softmaxed_model(x, w1, b1, w2, b2)
    out = jax.block_until_ready(out)
    ref = _reference(x, w1, b1, w2, b2)
    assert out.shape == (B, C)
    assert jnp.allclose(jnp.sum(out, axis=1), 1.0, atol=1e-5)
    assert jnp.allclose(out, ref, atol=1e-5, rtol=1e-5)

    # Exercise the multi-tile + ragged-last-block path (no host-side padding).
    B2 = 200
    x2 = jax.random.normal(kx, (B2, F), dtype=jnp.float32)
    out2 = jax.block_until_ready(softmaxed_model(x2, w1, b1, w2, b2, block_b=64))
    ref2 = _reference(x2, w1, b1, w2, b2)
    assert out2.shape == (B2, C)
    assert jnp.allclose(jnp.sum(out2, axis=1), 1.0, atol=1e-5)
    assert jnp.allclose(out2, ref2, atol=1e-5, rtol=1e-5)

    print("KERNEL_OK")
</pallas_src>

<mosaic_0001>
module attributes {stable_mosaic.version = 11 : i64} {
  func.func @_softmaxed_mlp_kernel(%arg0: i32, %arg1: memref<8x32xf32, #tpu.memory_space<vmem>>, %arg2: memref<32x32xf32, #tpu.memory_space<vmem>>, %arg3: memref<1x32xf32, #tpu.memory_space<vmem>>, %arg4: memref<32x1xf32, #tpu.memory_space<vmem>>, %arg5: memref<1x1xf32, #tpu.memory_space<vmem>>, %arg6: memref<8x2xf32, #tpu.memory_space<vmem>>) attributes {dimension_semantics = [#tpu.dimension_semantics<parallel>], iteration_bounds = array<i64: 1>, scalar_prefetch = 0 : i64, scratch_operands = 0 : i64, tpu.core_type = #tpu.core_type<tc>, window_params = [{transform_indices = @transform_0, window_bounds = array<i64: 8, 32>}, {pipeline_mode = #tpu.pipeline_mode<synchronous>, transform_indices = @transform_1, window_bounds = array<i64: 32, 32>}, {pipeline_mode = #tpu.pipeline_mode<synchronous>, transform_indices = @transform_2, window_bounds = array<i64: 1, 32>}, {pipeline_mode = #tpu.pipeline_mode<synchronous>, transform_indices = @transform_3, window_bounds = array<i64: 32, 1>}, {pipeline_mode = #tpu.pipeline_mode<synchronous>, transform_indices = @transform_4, window_bounds = array<i64: 1, 1>}, {transform_indices = @transform_5, window_bounds = array<i64: 8, 2>}]} {
    %c0 = arith.constant 0 : index
    %c0_0 = arith.constant 0 : index
    %0 = vector.load %arg1[%c0, %c0_0] : memref<8x32xf32, #tpu.memory_space<vmem>>, vector<8x32xf32>
    %c0_1 = arith.constant 0 : index
    %c0_2 = arith.constant 0 : index
    %1 = vector.load %arg2[%c0_1, %c0_2] : memref<32x32xf32, #tpu.memory_space<vmem>>, vector<32x32xf32>
    %cst = arith.constant dense<0.000000e+00> : vector<8x32xf32>
    %2 = tpu.matmul %0, %1, %cst {dimension_numbers = #tpu.dot_dimension_numbers<[1], [0], [0], [1], [0, 0, 1, 1], [], []>} : vector<8x32xf32>, vector<32x32xf32>, vector<8x32xf32> -> vector<8x32xf32>
    %c0_3 = arith.constant 0 : index
    %c0_4 = arith.constant 0 : index
    %3 = vector.load %arg3[%c0_3, %c0_4] : memref<1x32xf32, #tpu.memory_space<vmem>>, vector<1x32xf32>
    %4 = vector.broadcast %3 : vector<1x32xf32> to vector<8x32xf32>
    %5 = arith.addf %2, %4 : vector<8x32xf32>
    %cst_5 = arith.constant 0.000000e+00 : f32
    %6 = vector.broadcast %cst_5 : f32 to vector<8x32xf32>
    %7 = arith.maximumf %5, %6 : vector<8x32xf32>
    %c0_6 = arith.constant 0 : index
    %c0_7 = arith.constant 0 : index
    %8 = vector.load %arg4[%c0_6, %c0_7] : memref<32x1xf32, #tpu.memory_space<vmem>>, vector<32x1xf32>
    %cst_8 = arith.constant dense<0.000000e+00> : vector<8x1xf32>
    %9 = tpu.matmul %7, %8, %cst_8 {dimension_numbers = #tpu.dot_dimension_numbers<[1], [0], [0], [1], [0, 0, 1, 1], [], []>} : vector<8x32xf32>, vector<32x1xf32>, vector<8x1xf32> -> vector<8x1xf32>
    %c0_9 = arith.constant 0 : index
    %c0_10 = arith.constant 0 : index
    %10 = vector.load %arg5[%c0_9, %c0_10] : memref<1x1xf32, #tpu.memory_space<vmem>>, vector<1x1xf32>
    %11 = vector.broadcast %10 : vector<1x1xf32> to vector<8x1xf32>
    %12 = arith.addf %9, %11 : vector<8x1xf32>
    %cst_11 = arith.constant 5.000000e-01 : f32
    %13 = vector.broadcast %cst_11 : f32 to vector<8x1xf32>
    %14 = arith.mulf %13, %12 : vector<8x1xf32>
    %15 = math.tanh %14 : vector<8x1xf32>
    %cst_12 = arith.constant 5.000000e-01 : f32
    %16 = vector.broadcast %cst_12 : f32 to vector<8x1xf32>
    %17 = arith.mulf %16, %15 : vector<8x1xf32>
    %18 = tpu.iota {dimensions = array<i32: 1>} : vector<8x2xi32>
    %c0_i32 = arith.constant 0 : i32
    %19 = vector.broadcast %c0_i32 : i32 to vector<8x2xi32>
    %20 = arith.cmpi eq, %18, %19 : vector<8x2xi32>
    %cst_13 = arith.constant 0.000000e+00 : f32
    %21 = vector.broadcast %cst_13 : f32 to vector<8x1xf32>
    %22 = arith.subf %21, %17 : vector<8x1xf32>
    %23 = vector.shape_cast %17 : vector<8x1xf32> to vector<8x1xf32>
    %24 = vector.broadcast %23 : vector<8x1xf32> to vector<8x2xf32>
    %25 = vector.shape_cast %22 : vector<8x1xf32> to vector<8x1xf32>
    %26 = vector.broadcast %25 : vector<8x1xf32> to vector<8x2xf32>
    %27 = arith.select %20, %24, %26 : vector<8x2xi1>, vector<8x2xf32>
    %cst_14 = arith.constant 5.000000e-01 : f32
    %28 = vector.broadcast %cst_14 : f32 to vector<8x2xf32>
    %29 = arith.addf %28, %27 : vector<8x2xf32>
    %c0_15 = arith.constant 0 : index
    %c0_16 = arith.constant 0 : index
    %30 = vector.load %arg6[%c0_15, %c0_16] : memref<8x2xf32, #tpu.memory_space<vmem>>, vector<8x2xf32>
    tpu.vector_store %arg6[%c0_15, %c0_16], %29 {strides = array<i32>} : memref<8x2xf32, #tpu.memory_space<vmem>>, vector<8x2xf32>,
    return
  }
  func.func @transform_0(%arg0: i32) -> (i32, i32) {
    %c0_i32 = arith.constant 0 : i32
    %c0_i32_0 = arith.constant 0 : i32
    return %arg0, %c0_i32 : i32, i32
  }
  func.func @transform_1(%arg0: i32) -> (i32, i32) {
    %c0_i32 = arith.constant 0 : i32
    %c0_i32_0 = arith.constant 0 : i32
    %c0_i32_1 = arith.constant 0 : i32
    return %c0_i32, %c0_i32_0 : i32, i32
  }
  func.func @transform_2(%arg0: i32) -> (i32, i32) {
    %c0_i32 = arith.constant 0 : i32
    %c0_i32_0 = arith.constant 0 : i32
    %c0_i32_1 = arith.constant 0 : i32
    return %c0_i32, %c0_i32_0 : i32, i32
  }
  func.func @transform_3(%arg0: i32) -> (i32, i32) {
    %c0_i32 = arith.constant 0 : i32
    %c0_i32_0 = arith.constant 0 : i32
    %c0_i32_1 = arith.constant 0 : i32
    return %c0_i32, %c0_i32_0 : i32, i32
  }
  func.func @transform_4(%arg0: i32) -> (i32, i32) {
    %c0_i32 = arith.constant 0 : i32
    %c0_i32_0 = arith.constant 0 : i32
    %c0_i32_1 = arith.constant 0 : i32
    return %c0_i32, %c0_i32_0 : i32, i32
  }
  func.func @transform_5(%arg0: i32) -> (i32, i32) {
    %c0_i32 = arith.constant 0 : i32
    %c0_i32_0 = arith.constant 0 : i32
    return %arg0, %c0_i32 : i32, i32
  }
}

</mosaic_0001>

<bundles_post_ra>
// kernel: tpu_custom_call.1
= control target key start
LH: loop header
LB: loop body
LE: loop exit
PB: predicated region body
PF: predicated region fallthrough
CT: control target
= control target key end

     0   :  { %v273_v0 = vmov 0.0|0.0   ;;  %vm274_vm0 = vmmov 0   ;;  %v275_v4 = vmov 0.0   ;;  %vm34_vm1 = vcmask 261120   ;;  %s343_s1 = inlined_call_operand.vmem [shape: f32[32,32], index: 1, kind: input, shape index: {}]   ;;  %s344_s3 = inlined_call_operand.vmem [shape: f32[32,1], index: 3, kind: input, shape index: {}]   ;;  %s345_s0 = inlined_call_operand.vmem [shape: f32[8,32], index: 0, kind: input, shape index: {}]   ;;  %s346_s4 = inlined_call_operand.<no memory space> [shape: f32[1,1], index: 4, kind: input, shape index: {}]   ;;  %s347_s2 = inlined_call_operand.vmem [shape: f32[1,32], index: 2, kind: input, shape index: {}]   ;;  %s348_s5 = inlined_call_operand.vmem [shape: f32[8,2], index: 5, kind: output, shape index: {}]  }
   0x1   :  { %254 = vmatprep.subr.bf16.mxu0 %v273_v0  ;;  %v23_v1 = vld [vmem:[%s343_s1] sm:$0xff]  ;;  %v24_v2 = vld [vmem:[%s343_s1 + $0x8] sm:$0xff]  ;;  %v25_v3 = vld [vmem:[%s343_s1 + $0x10] sm:$0xff]  ;;  %240 = vmatprep.mubr.msk.f32.mxu0 %vm274_vm0, %v275_v4  ;;  %v10_v15 = vstv %s346_s4  ;;  %v276_v21 = vmov 0   ;;  %v196_v30 = vlaneseq  ;;  %vm212_vm3 = vcmask 15360  }
   0x2   :  { %v255_v5 = vpack.c.bf16 %v24_v2, %v23_v1  ;;  %v26_v6 = vld [vmem:[%s343_s1 + $0x18] sm:$0xff]  ;;  %260 = vmatprep.subr.bf16.mxu1 %v273_v0  ;;  %v109_v7 = vld [vmem:[%s344_s3] sm:$0xff]  ;;  %251 = vmatprep.mubr.msk.f32.mxu1 %vm274_vm0, %v275_v4  ;;  %v110_v8 = vld [vmem:[%s344_s3 + $0x8] sm:$0xff]  ;;  %11 = vst [vmem:[#allocation2] sm:$0x1] %v10_v15 }
   0x3   :  { %v258_v9 = vpack.c.bf16 %v26_v6, %v25_v3  ;;  %v261_v10 = vpack.c.bf16 %v110_v8, %v109_v7  ;;  %v22_v11 = vld [vmem:[%s345_s0] sm:$0xff]  ;;  %v111_v12 = vld [vmem:[%s344_s3 + $0x10] sm:$0xff]  ;;  %v112_v13 = vld [vmem:[%s344_s3 + $0x18] sm:$0xff]  ;;  %270 = vset.pattern.permute.xlu0 %v276_v21  ;;  %v197_v31 = vand.u32 127, %v196_v30 }
   0x4   :  { %256 = vmatpush3.bf16.msra.mxu0 %v255_v5  ;;  %v264_v14 = vpack.c.bf16 %v112_v13, %v111_v12  ;;  %v218_v16 = vld [vmem:[%s347_s2] ss:$0 sm:$0xff] }
   0x5   :  { %257 = vmatprep.subr.bf16.mxu0 %v273_v0  ;;  %262 = vmatpush3.bf16.msra.mxu1 %v261_v10  ;;  %vm198_vm2 = vcmp.eq.s32.totalorder %v197_v31, 0 }
   0x6   :  { %263 = vmatprep.subr.bf16.mxu1 %v273_v0 }
   0x8   :  { %259 = vmatpush3.bf16.msra.mxu0 %v258_v9 }
   0x9   :  { %265 = vmatpush3.bf16.msra.mxu1 %v264_v14  ;;  %v220_v22 = vld [vmem:[#allocation2] ss:$0 sm:$0xff] }
   0xb   :  { %241 = vmatmul.mubr.msk.f32.vlgmr.msra.gmra.mrb[0].mxu0 %vm34_vm1, %v22_v11 }
  0xde   :  { %v104_v17 = vpop.f32.mrb[0].mxu0 }
  0xdf   :  { %v105_v18 = vadd.f32 %v218_v16, %v104_v17  ;;  %v242_v19 = vpop.f32.mrb[1].mxu0 }
  0xe1   :  { %v108_v20 = vmax.f32 %v105_v18, 0.0 }
  0xe3   :  { %252 = vmatmul.mubr.msk.f32.vlgmr.msra.gmra.mrb[0].mxu1 %vm34_vm1, %v108_v20 }
 0x1b6   :  { %v189_v23 = vpop.f32.mrb[0].mxu1 }
 0x1b7   :  { %v190_v24 = vadd.f32 %v220_v22, %v189_v23  ;;  %v253_v25 = vpop.f32.mrb[1].mxu1 }
 0x1b9   :  { %v193_v26 = vmul.f32 0.5, %v190_v24 }
 0x1bb   :  { %271 = vtanh.f32 %v193_v26 }
 0x1c5   :  { %v272_v27 = vpop.eup %271 }
 0x1c6   :  { %v195_v28 = vmul.f32 0.5, %v272_v27 }
 0x1c8   :  { %202 = vperm.xlu0 %270, %v195_v28   ;;  %v199_v29 = vsub.f32 0.0, %v195_v28 }
 0x1cc   :  { %207 = vperm.xlu0 %270, %v199_v29  }
 0x247   :  { %v203_v32 = vpop.permute.xlu0 %202 }
 0x24b   :  { %v208_v33 = vpop.permute.xlu0 %207 }
 0x24c   :  { %v210_v34 = vsel %vm198_vm2, %v203_v32, %v208_v33 }
 0x24d   :  { %v211_v35 = vadd.f32 0.5, %v210_v34 }
 0x24f   :  { %213 = vst.msk [vmem:[%s348_s5] sm:$0xff] %vm212_vm3, %v211_v35 }

</bundles_post_ra>
